<compile_context>
chip_gen: v6e
topology: v6e:2x2x1
jax: 0.10.0
libtpu: 0.0.40
codegen_flags: <defaults>
</compile_context>

<pallas_src>
import functools

import jax
import jax.numpy as jnp
from jax import lax
from jax.experimental import pallas as pl
from jax.experimental.pallas import tpu as pltpu

_NEG_BIG = -1e30
_LANES = 128
_PAD_LABEL_ANCHOR = -2_147_483_647    # sentinel labels for padded rows / cols
_PAD_LABEL_CONTRAST = -2_147_483_646  # (distinct, so padding never "matches")
_VMEM_BUDGET = 20 * 1024 * 1024       # design target, fits v7x's 32 MiB scoped default


def _round_up(x, m):
    return (x + m - 1) // m * m


def _pad2d(x, rows, cols, value=0.0):
    pr, pc = rows - x.shape[0], cols - x.shape[1]
    if pr == 0 and pc == 0:
        return x
    return jnp.pad(x, ((0, pr), (0, pc)), constant_values=value)


def _pad1d(x, n, value):
    if x.shape[0] == n:
        return x
    return jnp.pad(x, (0, n - x.shape[0]), constant_values=value)


def _supcon_kernel(a_ref, c_ref,
                   al_ref, asi_ref, aid_ref, pc_ref,
                   cl_ref, csi_ref, cid_ref, cbias_ref,
                   out_ref,
                   m_sc, s_sc, q_sc, *,
                   inv_t_pos, inv_t_neg, apply_col_bias):
    j = pl.program_id(1)   # contrast tile index (reduction axis, innermost)

    @pl.when(j == 0)
    def _init():
        m_sc[...] = jnp.full(m_sc.shape, _NEG_BIG, jnp.float32)
        s_sc[...] = jnp.zeros(s_sc.shape, jnp.float32)
        q_sc[...] = jnp.zeros(q_sc.shape, jnp.float32)

    # (TA, TN) similarities on the MXU: bf16 (or f32) inputs, f32 accumulation,
    # contracting the shared feature dim of both operands (A @ C^T).
    sim = lax.dot_general(a_ref[...], c_ref[...],
                          (((1,), (1,)), ((), ())),
                          preferred_element_type=jnp.float32)
    ta = a_ref.shape[0]
    tn = c_ref.shape[0]

    # Row-side metadata, broadcast to lane width once (hoisted out of the
    # lane-group loop; JAX does not CSE broadcast_in_dim).
    al = jnp.broadcast_to(al_ref[...], (ta, _LANES))    # anchor labels
    asi = jnp.broadcast_to(asi_ref[...], (ta, _LANES))  # anchor sample index
    aid = jnp.broadcast_to(aid_ref[...], (ta, _LANES))  # anchor global index

    itp = jnp.float32(inv_t_pos)
    itn = jnp.float32(inv_t_neg)

    # 128 independent per-lane online log-sum-exp streams: fold the TN/128 lane
    # groups of this tile into the (TA, 128) accumulators with elementwise
    # VPU/EUP work only.  The cross-lane (XLU) merge happens once per anchor
    # tile in the finalize step below.
    for g in range(tn // _LANES):
        sl = slice(g * _LANES, (g + 1) * _LANES)
        sim_g = sim[:, sl]
        cl_g = cl_ref[:, sl]
        csi_g = csi_ref[:, sl]
        cid_g = cid_ref[:, sl]

        same = al == cl_g                              # same class (incl. self)
        not_self = aid != cid_g                        # logits_mask
        excl = jnp.logical_and(same, asi != csi_g)     # same class, other sample

        # Fused dual-temperature scaling: sim/t_pos on same-class else sim/t_neg.
        adc = sim_g * jnp.where(same, itp, itn)
        if apply_col_bias:
            adc = adc + cbias_ref[:, sl]               # -BIG on padded columns

        m_prev = m_sc[...]
        m_new = jnp.maximum(m_prev, adc)
        r = jnp.exp(m_prev - m_new)
        e = jnp.exp(adc - m_new)
        e = jnp.where(not_self, e, 0.0)
        e = jnp.where(excl, 0.0, e)                    # out-of-class denominator
        s_sc[...] = s_sc[...] * r + e

        posm = jnp.logical_and(same, not_self)
        q_sc[...] = q_sc[...] + jnp.where(posm, adc, 0.0)
        m_sc[...] = m_new

    @pl.when(j == pl.num_programs(1) - 1)
    def _finalize():
        m_lane = m_sc[...]                                         # (TA, 128)
        m_row = jnp.max(m_lane, axis=1, keepdims=True)             # (TA, 1)
        s_row = jnp.sum(s_sc[...] * jnp.exp(m_lane - m_row),
                        axis=1, keepdims=True)
        q_row = jnp.sum(q_sc[...], axis=1, keepdims=True)
        # loss_row = logsumexp_keep(adc) - mean_pos(adc)
        # (real anchors with zero positives give 0/0 = nan, matching torch;
        #  padded anchor rows use pc=1 and are sliced off in the wrapper)
        loss = m_row + jnp.log(s_row) - q_row / pc_ref[...]
        out_ref[...] = jnp.broadcast_to(loss, out_ref.shape)       # lane-dense


def _dense_reference(features, base_mask, *, t_pos, t_neg, contrast_mode='all'):
    """Pure-jnp mirror of the PyTorch forward (also the explicit-mask path)."""
    bsz, n_views, dim = features.shape
    contrast_count = n_views
    contrast_feature = jnp.transpose(features, (1, 0, 2)).reshape(n_views * bsz, dim)
    if contrast_mode == 'one':
        anchor_feature = features[:, 0]
        anchor_count = 1
    elif contrast_mode == 'all':
        anchor_feature = contrast_feature
        anchor_count = contrast_count
    else:
        raise ValueError('Unknown mode: {}'.format(contrast_mode))
    negative_mask = base_mask - jnp.eye(bsz, dtype=jnp.float32)
    mask = jnp.tile(base_mask, (anchor_count, contrast_count))
    negative_mask = jnp.tile(negative_mask, (anchor_count, contrast_count))
    similarity = anchor_feature @ contrast_feature.T
    adc = similarity / t_neg
    adc = adc + mask * adc * ((t_neg - t_pos) / t_pos)
    logits = adc - jnp.max(adc, axis=1, keepdims=True)
    A = bsz * anchor_count
    N = bsz * contrast_count
    logits_mask = 1.0 - (jnp.arange(N)[None, :] ==
                         jnp.arange(A)[:, None]).astype(jnp.float32)
    mask = mask * logits_mask
    exp_logits = jnp.exp(logits) * logits_mask
    filtered_denom = exp_logits - negative_mask * exp_logits
    log_prob = logits - jnp.log(jnp.sum(filtered_denom, axis=1, keepdims=True))
    mean_log_prob_pos = jnp.sum(mask * log_prob, axis=1) / jnp.sum(mask, axis=1)
    return jnp.mean((-mean_log_prob_pos).reshape(anchor_count, bsz))


def _pick_tiles(A, N, D_pad, bpe):
    """Tile sizes under a VMEM budget; splits the anchor axis for megacore."""
    if A >= 1024:
        TA = 512
    elif A > 8:
        # two anchor tiles so the "parallel" axis can shard across 2 TCs (v7x)
        TA = max(8, _round_up((A + 1) // 2, 8))
    else:
        TA = 8

    N_pad0 = _round_up(max(N, 1), _LANES)
    if N_pad0 * D_pad * bpe <= 6 * 1024 * 1024:
        # whole contrast matrix VMEM-resident (constant block index -> no
        # grid[0]-fold HBM re-streaming of the contrast features)
        TN = N_pad0
    else:
        TN = min(1024, N_pad0)

    def est(ta, tn):
        feat = 2 * 2 * (ta + tn) * D_pad * bpe          # double-buffered tiles
        sim = 4 * ta * tn                               # f32 matmul result
        acc = 3 * 4 * ta * _LANES                       # accumulators
        outb = 2 * 4 * ta * _LANES                      # output block
        meta = 2 * 4 * (4 * ta * _LANES + 4 * 8 * tn)   # small metadata blocks
        return feat + sim + acc + outb + meta

    # TODO(synk): for very large feature dims (D_pad >~ 8K) a third reduction
    # grid axis over D would keep tiles large; here we shrink TN/TA instead.
    while est(TA, TN) > _VMEM_BUDGET and TN > _LANES:
        TN = _round_up(TN // 2, _LANES)
    while est(TA, TN) > _VMEM_BUDGET and TA >= 32 and TA % 16 == 0:
        TA //= 2
    return TA, TN


def supcon_loss_occ_dualt(features, labels=None, mask=None, *,
                          temperature_pos=0.07, contrast_mode='all',
                          pos_neg_ratio=10, feature_dtype=jnp.bfloat16):
    """JAX/Pallas port of SupConLossOCCDualT.forward."""
    t_pos = float(temperature_pos)
    t_neg = t_pos / float(pos_neg_ratio)

    if features.ndim < 3:
        raise ValueError('`features` needs to be [bsz, n_views, ...]')
    if features.ndim > 3:
        features = features.reshape(features.shape[0], features.shape[1], -1)
    features = features.astype(jnp.float32)
    bsz, n_views, dim = features.shape

    if labels is not None and mask is not None:
        raise ValueError('Cannot define both `labels` and `mask`')

    if mask is not None:
        # TODO(synk): explicit (possibly asymmetric) `mask` path is not ported to
        # the label-based Pallas kernel; dense jnp fallback preserves semantics.
        return _dense_reference(features, mask.astype(jnp.float32),
                                t_pos=t_pos, t_neg=t_neg,
                                contrast_mode=contrast_mode)

    if labels is None:
        labels_flat = jnp.arange(bsz, dtype=jnp.int32)   # mask == eye (SimCLR)
    else:
        labels_flat = jnp.asarray(labels).reshape(-1).astype(jnp.int32)
        if labels_flat.shape[0] != bsz:
            raise ValueError('Num of labels does not match num of features')

    # positives per sample = (#same-label samples) * n_views - 1 (== mask.sum(1))
    same_count = jnp.sum(labels_flat[:, None] == labels_flat[None, :],
                         axis=1).astype(jnp.float32)
    pos_count = same_count * jnp.float32(n_views) - 1.0

    # view-major concat == torch.cat(torch.unbind(features, dim=1), dim=0)
    contrast_feature = jnp.transpose(features, (1, 0, 2)).reshape(n_views * bsz, dim)
    sample_idx = jnp.arange(bsz, dtype=jnp.int32)
    contrast_labels = jnp.tile(labels_flat, n_views)
    contrast_sidx = jnp.tile(sample_idx, n_views)

    if contrast_mode == 'one':
        anchor_feature = features[:, 0, :]
        anchor_labels = labels_flat
        anchor_sidx = sample_idx
        anchor_pos = pos_count
    elif contrast_mode == 'all':
        anchor_feature = contrast_feature
        anchor_labels = contrast_labels
        anchor_sidx = contrast_sidx
        anchor_pos = jnp.tile(pos_count, n_views)
    else:
        raise ValueError('Unknown mode: {}'.format(contrast_mode))

    A = anchor_feature.shape[0]
    N = contrast_feature.shape[0]
    D_pad = _round_up(dim, _LANES)
    bpe = jnp.dtype(feature_dtype).itemsize

    TA, TN = _pick_tiles(A, N, D_pad, bpe)
    A_pad = _round_up(A, TA)
    N_pad = _round_up(N, TN)

    a_p = _pad2d(anchor_feature, A_pad, D_pad).astype(feature_dtype)
    c_p = _pad2d(contrast_feature, N_pad, D_pad).astype(feature_dtype)

    al = _pad1d(anchor_labels, A_pad, _PAD_LABEL_ANCHOR).reshape(A_pad, 1)
    asi = _pad1d(anchor_sidx, A_pad, -1).reshape(A_pad, 1)
    aid = _pad1d(jnp.arange(A, dtype=jnp.int32), A_pad, -1).reshape(A_pad, 1)
    pc = _pad1d(anchor_pos, A_pad, 1.0).reshape(A_pad, 1).astype(jnp.float32)

    cl = _pad1d(contrast_labels, N_pad, _PAD_LABEL_CONTRAST).reshape(1, N_pad)
    csi = _pad1d(contrast_sidx, N_pad, -2).reshape(1, N_pad)
    cid = jnp.arange(N_pad, dtype=jnp.int32).reshape(1, N_pad)
    cbias = jnp.where(jnp.arange(N_pad) < N, 0.0,
                      _NEG_BIG).astype(jnp.float32).reshape(1, N_pad)

    grid = (A_pad // TA, N_pad // TN)
    apply_col_bias = N_pad != N

    kernel = functools.partial(
        _supcon_kernel,
        inv_t_pos=1.0 / t_pos, inv_t_neg=1.0 / t_neg,
        apply_col_bias=apply_col_bias)

    cost = pl.CostEstimate(
        flops=2 * A_pad * N_pad * D_pad,
        transcendentals=2 * A_pad * N_pad,
        bytes_accessed=int(bpe * (A_pad * D_pad + grid[0] * N_pad * D_pad)
                           + 4 * A_pad * _LANES))

    row_spec = lambda i, j: (i, 0)
    col_spec = lambda i, j: (0, j)

    per_anchor = pl.pallas_call(
        kernel,
        out_shape=jax.ShapeDtypeStruct((A_pad, _LANES), jnp.float32),
        grid_spec=pltpu.PrefetchScalarGridSpec(
            num_scalar_prefetch=0,
            grid=grid,
            in_specs=[
                pl.BlockSpec((TA, D_pad), row_spec),   # anchor features
                pl.BlockSpec((TN, D_pad), col_spec),   # contrast features
                pl.BlockSpec((TA, 1), row_spec),       # anchor labels
                pl.BlockSpec((TA, 1), row_spec),       # anchor sample idx
                pl.BlockSpec((TA, 1), row_spec),       # anchor global idx
                pl.BlockSpec((TA, 1), row_spec),       # anchor positive count
                pl.BlockSpec((1, TN), col_spec),       # contrast labels
                pl.BlockSpec((1, TN), col_spec),       # contrast sample idx
                pl.BlockSpec((1, TN), col_spec),       # contrast global idx
                pl.BlockSpec((1, TN), col_spec),       # padded-column bias
            ],
            out_specs=pl.BlockSpec((TA, _LANES), row_spec),
            scratch_shapes=[pltpu.VMEM((TA, _LANES), jnp.float32)] * 3,
        ),
        compiler_params=pltpu.CompilerParams(
            dimension_semantics=("parallel", "arbitrary"),
            vmem_limit_bytes=32 * 1024 * 1024),
        cost_estimate=cost,
    )(a_p, c_p, al, asi, aid, pc, cl, csi, cid, cbias)

    # loss.view(anchor_count, batch_size).mean() == mean over all real anchors.
    return jnp.mean(per_anchor[:A, 0])


if __name__ == "__main__":
    key = jax.random.PRNGKey(0)
    bsz, n_views, dim = 8, 2, 32

    kf, _ = jax.random.split(key)
    features = jax.random.normal(kf, (bsz, n_views, dim), dtype=jnp.float32)
    features = features / jnp.linalg.norm(features, axis=-1, keepdims=True)
    labels = jnp.array([0, 1, 2, 3, 0, 1, 2, 3], dtype=jnp.int32)
    base_mask = (labels[:, None] == labels[None, :]).astype(jnp.float32)

    # f32-feature mode: strict checks against the dense jnp reference.
    loss = jax.block_until_ready(
        supcon_loss_occ_dualt(features, labels, feature_dtype=jnp.float32))
    ref = _dense_reference(features, base_mask, t_pos=0.07, t_neg=0.07 / 10)
    assert jnp.isfinite(loss), "loss is not finite"
    assert jnp.allclose(loss, ref, rtol=1e-3, atol=1e-3), (loss, ref)

    # supervised, contrast_mode='one'
    loss_one = jax.block_until_ready(
        supcon_loss_occ_dualt(features, labels, contrast_mode='one',
                              feature_dtype=jnp.float32))
    ref_one = _dense_reference(features, base_mask, t_pos=0.07, t_neg=0.07 / 10,
                               contrast_mode='one')
    assert jnp.allclose(loss_one, ref_one, rtol=1e-3, atol=1e-3), (loss_one, ref_one)

    # unsupervised (SimCLR-style, labels=None)
    loss_u = jax.block_until_ready(
        supcon_loss_occ_dualt(features, feature_dtype=jnp.float32))
    ref_u = _dense_reference(features, jnp.eye(bsz, dtype=jnp.float32),
                             t_pos=0.07, t_neg=0.07 / 10)
    assert jnp.allclose(loss_u, ref_u, rtol=1e-3, atol=1e-3), (loss_u, ref_u)

    # default performance path (bf16 MXU feed, f32 accumulation): loose tolerance
    loss_bf16 = jax.block_until_ready(supcon_loss_occ_dualt(features, labels))
    assert jnp.isfinite(loss_bf16), "bf16 loss is not finite"
    assert jnp.allclose(loss_bf16, ref, rtol=3e-2, atol=3e-1), (loss_bf16, ref)

    print("KERNEL_OK")
</pallas_src>

<mosaic_0001>
module attributes {stable_mosaic.version = 11 : i64} {
  func.func @_supcon_kernel(%arg0: i32, %arg1: i32, %arg2: memref<8x128xf32, #tpu.memory_space<vmem>>, %arg3: memref<128x128xf32, #tpu.memory_space<vmem>>, %arg4: memref<8x1xi32, #tpu.memory_space<vmem>>, %arg5: memref<8x1xi32, #tpu.memory_space<vmem>>, %arg6: memref<8x1xi32, #tpu.memory_space<vmem>>, %arg7: memref<8x1xf32, #tpu.memory_space<vmem>>, %arg8: memref<1x128xi32, #tpu.memory_space<vmem>>, %arg9: memref<1x128xi32, #tpu.memory_space<vmem>>, %arg10: memref<1x128xi32, #tpu.memory_space<vmem>>, %arg11: memref<1x128xf32, #tpu.memory_space<vmem>>, %arg12: memref<8x128xf32, #tpu.memory_space<vmem>>, %arg13: memref<8x128xf32, #tpu.memory_space<vmem>>, %arg14: memref<8x128xf32, #tpu.memory_space<vmem>>, %arg15: memref<8x128xf32, #tpu.memory_space<vmem>>) attributes {dimension_semantics = [#tpu.dimension_semantics<parallel>, #tpu.dimension_semantics<arbitrary>], iteration_bounds = array<i64: 2, 1>, scalar_prefetch = 0 : i64, scratch_operands = 3 : i64, tpu.core_type = #tpu.core_type<tc>, window_params = [{transform_indices = @transform_0, window_bounds = array<i64: 8, 128>}, {transform_indices = @transform_1, window_bounds = array<i64: 128, 128>}, {transform_indices = @transform_2, window_bounds = array<i64: 8, 1>}, {transform_indices = @transform_3, window_bounds = array<i64: 8, 1>}, {transform_indices = @transform_4, window_bounds = array<i64: 8, 1>}, {transform_indices = @transform_5, window_bounds = array<i64: 8, 1>}, {transform_indices = @transform_6, window_bounds = array<i64: 1, 128>}, {transform_indices = @transform_7, window_bounds = array<i64: 1, 128>}, {transform_indices = @transform_8, window_bounds = array<i64: 1, 128>}, {transform_indices = @transform_9, window_bounds = array<i64: 1, 128>}, {transform_indices = @transform_10, window_bounds = array<i64: 8, 128>}]} {
    %c0_i32 = arith.constant 0 : i32
    %0 = arith.cmpi eq, %arg1, %c0_i32 : i32
    %1 = arith.extui %0 : i1 to i32
    %c0_i32_0 = arith.constant 0 : i32
    %2 = arith.cmpi ne, %1, %c0_i32_0 : i32
    scf.if %2 {
      %cst_37 = arith.constant -1.000000e+30 : f32
      %56 = vector.broadcast %cst_37 : f32 to vector<8x128xf32>
      %c0_38 = arith.constant 0 : index
      %c0_39 = arith.constant 0 : index
      %57 = vector.load %arg13[%c0_38, %c0_39] : memref<8x128xf32, #tpu.memory_space<vmem>>, vector<8x128xf32>
      tpu.vector_store %arg13[%c0_38, %c0_39], %56 {strides = array<i32>} : memref<8x128xf32, #tpu.memory_space<vmem>>, vector<8x128xf32>,
      %cst_40 = arith.constant 0.000000e+00 : f32
      %58 = vector.broadcast %cst_40 : f32 to vector<8x128xf32>
      %c0_41 = arith.constant 0 : index
      %c0_42 = arith.constant 0 : index
      %59 = vector.load %arg14[%c0_41, %c0_42] : memref<8x128xf32, #tpu.memory_space<vmem>>, vector<8x128xf32>
      tpu.vector_store %arg14[%c0_41, %c0_42], %58 {strides = array<i32>} : memref<8x128xf32, #tpu.memory_space<vmem>>, vector<8x128xf32>,
      %cst_43 = arith.constant 0.000000e+00 : f32
      %60 = vector.broadcast %cst_43 : f32 to vector<8x128xf32>
      %c0_44 = arith.constant 0 : index
      %c0_45 = arith.constant 0 : index
      %61 = vector.load %arg15[%c0_44, %c0_45] : memref<8x128xf32, #tpu.memory_space<vmem>>, vector<8x128xf32>
      tpu.vector_store %arg15[%c0_44, %c0_45], %60 {strides = array<i32>} : memref<8x128xf32, #tpu.memory_space<vmem>>, vector<8x128xf32>,
    } else {
    }
    %c0 = arith.constant 0 : index
    %c0_1 = arith.constant 0 : index
    %3 = vector.load %arg2[%c0, %c0_1] : memref<8x128xf32, #tpu.memory_space<vmem>>, vector<8x128xf32>
    %c0_2 = arith.constant 0 : index
    %c0_3 = arith.constant 0 : index
    %4 = vector.load %arg3[%c0_2, %c0_3] : memref<128x128xf32, #tpu.memory_space<vmem>>, vector<128x128xf32>
    %cst = arith.constant dense<0.000000e+00> : vector<8x128xf32>
    %5 = tpu.matmul %3, %4, %cst {dimension_numbers = #tpu.dot_dimension_numbers<[1], [1], [0], [0], [0, 0, 1, 0], [], []>} : vector<8x128xf32>, vector<128x128xf32>, vector<8x128xf32> -> vector<8x128xf32>
    %c0_4 = arith.constant 0 : index
    %c0_5 = arith.constant 0 : index
    %6 = vector.load %arg4[%c0_4, %c0_5] : memref<8x1xi32, #tpu.memory_space<vmem>>, vector<8x1xi32>
    %7 = vector.shape_cast %6 : vector<8x1xi32> to vector<8x1xi32>
    %8 = vector.broadcast %7 : vector<8x1xi32> to vector<8x128xi32>
    %c0_6 = arith.constant 0 : index
    %c0_7 = arith.constant 0 : index
    %9 = vector.load %arg5[%c0_6, %c0_7] : memref<8x1xi32, #tpu.memory_space<vmem>>, vector<8x1xi32>
    %10 = vector.shape_cast %9 : vector<8x1xi32> to vector<8x1xi32>
    %11 = vector.broadcast %10 : vector<8x1xi32> to vector<8x128xi32>
    %c0_8 = arith.constant 0 : index
    %c0_9 = arith.constant 0 : index
    %12 = vector.load %arg6[%c0_8, %c0_9] : memref<8x1xi32, #tpu.memory_space<vmem>>, vector<8x1xi32>
    %13 = vector.shape_cast %12 : vector<8x1xi32> to vector<8x1xi32>
    %14 = vector.broadcast %13 : vector<8x1xi32> to vector<8x128xi32>
    %c0_10 = arith.constant 0 : index
    %c0_11 = arith.constant 0 : index
    %15 = vector.load %arg8[%c0_10, %c0_11] : memref<1x128xi32, #tpu.memory_space<vmem>>, vector<1x128xi32>
    %c0_12 = arith.constant 0 : index
    %c0_13 = arith.constant 0 : index
    %16 = vector.load %arg9[%c0_12, %c0_13] : memref<1x128xi32, #tpu.memory_space<vmem>>, vector<1x128xi32>
    %c0_14 = arith.constant 0 : index
    %c0_15 = arith.constant 0 : index
    %17 = vector.load %arg10[%c0_14, %c0_15] : memref<1x128xi32, #tpu.memory_space<vmem>>, vector<1x128xi32>
    %18 = vector.broadcast %15 : vector<1x128xi32> to vector<8x128xi32>
    %19 = arith.cmpi eq, %8, %18 : vector<8x128xi32>
    %20 = vector.broadcast %17 : vector<1x128xi32> to vector<8x128xi32>
    %21 = arith.cmpi ne, %14, %20 : vector<8x128xi32>
    %22 = vector.broadcast %16 : vector<1x128xi32> to vector<8x128xi32>
    %23 = arith.cmpi ne, %11, %22 : vector<8x128xi32>
    %24 = arith.andi %19, %23 : vector<8x128xi1>
    %cst_16 = arith.constant 14.2857141 : f32
    %cst_17 = arith.constant 142.857147 : f32
    %25 = vector.broadcast %cst_16 : f32 to vector<8x128xf32>
    %26 = vector.broadcast %cst_17 : f32 to vector<8x128xf32>
    %27 = arith.select %19, %25, %26 : vector<8x128xi1>, vector<8x128xf32>
    %28 = arith.mulf %5, %27 : vector<8x128xf32>
    %c0_18 = arith.constant 0 : index
    %c0_19 = arith.constant 0 : index
    %29 = vector.load %arg11[%c0_18, %c0_19] : memref<1x128xf32, #tpu.memory_space<vmem>>, vector<1x128xf32>
    %30 = vector.broadcast %29 : vector<1x128xf32> to vector<8x128xf32>
    %31 = arith.addf %28, %30 : vector<8x128xf32>
    %c0_20 = arith.constant 0 : index
    %c0_21 = arith.constant 0 : index
    %32 = vector.load %arg13[%c0_20, %c0_21] : memref<8x128xf32, #tpu.memory_space<vmem>>, vector<8x128xf32>
    %33 = arith.maximumf %32, %31 : vector<8x128xf32>
    %34 = arith.subf %32, %33 : vector<8x128xf32>
    %35 = math.exp %34 : vector<8x128xf32>
    %36 = arith.subf %31, %33 : vector<8x128xf32>
    %37 = math.exp %36 : vector<8x128xf32>
    %cst_22 = arith.constant 0.000000e+00 : f32
    %38 = vector.broadcast %cst_22 : f32 to vector<8x128xf32>
    %39 = arith.select %21, %37, %38 : vector<8x128xi1>, vector<8x128xf32>
    %cst_23 = arith.constant 0.000000e+00 : f32
    %40 = vector.broadcast %cst_23 : f32 to vector<8x128xf32>
    %41 = arith.select %24, %40, %39 : vector<8x128xi1>, vector<8x128xf32>
    %c0_24 = arith.constant 0 : index
    %c0_25 = arith.constant 0 : index
    %42 = vector.load %arg14[%c0_24, %c0_25] : memref<8x128xf32, #tpu.memory_space<vmem>>, vector<8x128xf32>
    %43 = arith.mulf %42, %35 : vector<8x128xf32>
    %44 = arith.addf %43, %41 : vector<8x128xf32>
    %c0_26 = arith.constant 0 : index
    %c0_27 = arith.constant 0 : index
    %45 = vector.load %arg14[%c0_26, %c0_27] : memref<8x128xf32, #tpu.memory_space<vmem>>, vector<8x128xf32>
    tpu.vector_store %arg14[%c0_26, %c0_27], %44 {strides = array<i32>} : memref<8x128xf32, #tpu.memory_space<vmem>>, vector<8x128xf32>,
    %46 = arith.andi %19, %21 : vector<8x128xi1>
    %c0_28 = arith.constant 0 : index
    %c0_29 = arith.constant 0 : index
    %47 = vector.load %arg15[%c0_28, %c0_29] : memref<8x128xf32, #tpu.memory_space<vmem>>, vector<8x128xf32>
    %cst_30 = arith.constant 0.000000e+00 : f32
    %48 = vector.broadcast %cst_30 : f32 to vector<8x128xf32>
    %49 = arith.select %46, %31, %48 : vector<8x128xi1>, vector<8x128xf32>
    %50 = arith.addf %47, %49 : vector<8x128xf32>
    %c0_31 = arith.constant 0 : index
    %c0_32 = arith.constant 0 : index
    %51 = vector.load %arg15[%c0_31, %c0_32] : memref<8x128xf32, #tpu.memory_space<vmem>>, vector<8x128xf32>
    tpu.vector_store %arg15[%c0_31, %c0_32], %50 {strides = array<i32>} : memref<8x128xf32, #tpu.memory_space<vmem>>, vector<8x128xf32>,
    %c0_33 = arith.constant 0 : index
    %c0_34 = arith.constant 0 : index
    %52 = vector.load %arg13[%c0_33, %c0_34] : memref<8x128xf32, #tpu.memory_space<vmem>>, vector<8x128xf32>
    tpu.vector_store %arg13[%c0_33, %c0_34], %33 {strides = array<i32>} : memref<8x128xf32, #tpu.memory_space<vmem>>, vector<8x128xf32>,
    %c0_i32_35 = arith.constant 0 : i32
    %53 = arith.cmpi eq, %arg1, %c0_i32_35 : i32
    %54 = arith.extui %53 : i1 to i32
    %c0_i32_36 = arith.constant 0 : i32
    %55 = arith.cmpi ne, %54, %c0_i32_36 : i32
    scf.if %55 {
      %c0_37 = arith.constant 0 : index
      %c0_38 = arith.constant 0 : index
      %56 = vector.load %arg13[%c0_37, %c0_38] : memref<8x128xf32, #tpu.memory_space<vmem>>, vector<8x128xf32>
      %cst_39 = arith.constant dense<0xFF800000> : vector<8xf32>
      %57 = vector.multi_reduction <maximumf>, %56, %cst_39 [1] : vector<8x128xf32> to vector<8xf32>
      %58 = vector.shape_cast %57 : vector<8xf32> to vector<8x1xf32>
      %c0_40 = arith.constant 0 : index
      %c0_41 = arith.constant 0 : index
      %59 = vector.load %arg14[%c0_40, %c0_41] : memref<8x128xf32, #tpu.memory_space<vmem>>, vector<8x128xf32>
      %60 = vector.broadcast %58 : vector<8x1xf32> to vector<8x128xf32>
      %61 = arith.subf %56, %60 : vector<8x128xf32>
      %62 = math.exp %61 : vector<8x128xf32>
      %63 = arith.mulf %59, %62 : vector<8x128xf32>
      %cst_42 = arith.constant dense<0.000000e+00> : vector<8xf32>
      %64 = vector.multi_reduction <add>, %63, %cst_42 [1] : vector<8x128xf32> to vector<8xf32>
      %65 = vector.shape_cast %64 : vector<8xf32> to vector<8x1xf32>
      %c0_43 = arith.constant 0 : index
      %c0_44 = arith.constant 0 : index
      %66 = vector.load %arg15[%c0_43, %c0_44] : memref<8x128xf32, #tpu.memory_space<vmem>>, vector<8x128xf32>
      %cst_45 = arith.constant dense<0.000000e+00> : vector<8xf32>
      %67 = vector.multi_reduction <add>, %66, %cst_45 [1] : vector<8x128xf32> to vector<8xf32>
      %68 = vector.shape_cast %67 : vector<8xf32> to vector<8x1xf32>
      %69 = math.log %65 : vector<8x1xf32>
      %70 = arith.addf %58, %69 : vector<8x1xf32>
      %c0_46 = arith.constant 0 : index
      %c0_47 = arith.constant 0 : index
      %71 = vector.load %arg7[%c0_46, %c0_47] : memref<8x1xf32, #tpu.memory_space<vmem>>, vector<8x1xf32>
      %72 = arith.divf %68, %71 : vector<8x1xf32>
      %73 = arith.subf %70, %72 : vector<8x1xf32>
      %74 = vector.shape_cast %73 : vector<8x1xf32> to vector<8x1xf32>
      %75 = vector.broadcast %74 : vector<8x1xf32> to vector<8x128xf32>
      %c0_48 = arith.constant 0 : index
      %c0_49 = arith.constant 0 : index
      %76 = vector.load %arg12[%c0_48, %c0_49] : memref<8x128xf32, #tpu.memory_space<vmem>>, vector<8x128xf32>
      tpu.vector_store %arg12[%c0_48, %c0_49], %75 {strides = array<i32>} : memref<8x128xf32, #tpu.memory_space<vmem>>, vector<8x128xf32>,
    } else {
    }
    return
  }
  func.func @transform_0(%arg0: i32, %arg1: i32) -> (i32, i32) {
    %c0_i32 = arith.constant 0 : i32
    %c0_i32_0 = arith.constant 0 : i32
    return %arg0, %c0_i32 : i32, i32
  }
  func.func @transform_1(%arg0: i32, %arg1: i32) -> (i32, i32) {
    %c0_i32 = arith.constant 0 : i32
    %c0_i32_0 = arith.constant 0 : i32
    return %c0_i32, %arg1 : i32, i32
  }
  func.func @transform_2(%arg0: i32, %arg1: i32) -> (i32, i32) {
    %c0_i32 = arith.constant 0 : i32
    %c0_i32_0 = arith.constant 0 : i32
    return %arg0, %c0_i32 : i32, i32
  }
  func.func @transform_3(%arg0: i32, %arg1: i32) -> (i32, i32) {
    %c0_i32 = arith.constant 0 : i32
    %c0_i32_0 = arith.constant 0 : i32
    return %arg0, %c0_i32 : i32, i32
  }
  func.func @transform_4(%arg0: i32, %arg1: i32) -> (i32, i32) {
    %c0_i32 = arith.constant 0 : i32
    %c0_i32_0 = arith.constant 0 : i32
    return %arg0, %c0_i32 : i32, i32
  }
  func.func @transform_5(%arg0: i32, %arg1: i32) -> (i32, i32) {
    %c0_i32 = arith.constant 0 : i32
    %c0_i32_0 = arith.constant 0 : i32
    return %arg0, %c0_i32 : i32, i32
  }
  func.func @transform_6(%arg0: i32, %arg1: i32) -> (i32, i32) {
    %c0_i32 = arith.constant 0 : i32
    %c0_i32_0 = arith.constant 0 : i32
    return %c0_i32, %arg1 : i32, i32
  }
  func.func @transform_7(%arg0: i32, %arg1: i32) -> (i32, i32) {
    %c0_i32 = arith.constant 0 : i32
    %c0_i32_0 = arith.constant 0 : i32
    return %c0_i32, %arg1 : i32, i32
  }
  func.func @transform_8(%arg0: i32, %arg1: i32) -> (i32, i32) {
    %c0_i32 = arith.constant 0 : i32
    %c0_i32_0 = arith.constant 0 : i32
    return %c0_i32, %arg1 : i32, i32
  }
  func.func @transform_9(%arg0: i32, %arg1: i32) -> (i32, i32) {
    %c0_i32 = arith.constant 0 : i32
    %c0_i32_0 = arith.constant 0 : i32
    return %c0_i32, %arg1 : i32, i32
  }
  func.func @transform_10(%arg0: i32, %arg1: i32) -> (i32, i32) {
    %c0_i32 = arith.constant 0 : i32
    %c0_i32_0 = arith.constant 0 : i32
    return %arg0, %c0_i32 : i32, i32
  }
}

</mosaic_0001>

<bundles_post_ra>
// kernel: tpu_custom_call.1
= control target key start
LH: loop header
LB: loop body
LE: loop exit
PB: predicated region body
PF: predicated region fallthrough
CT: control target
= control target key end

     0   :  { %s1386_s0 = inlined_call_operand.vmem [shape: f32[16,128], index: 0, kind: input, shape index: {}]   ;;  %s1387_s1 = inlined_call_operand.hbm [shape: f32[128,128], index: 1, kind: input, shape index: {}]   ;;  %s1388_s2 = inlined_call_operand.vmem [shape: s32[16,1], index: 2, kind: input, shape index: {}]   ;;  %s1389_s3 = inlined_call_operand.vmem [shape: s32[16,1], index: 3, kind: input, shape index: {}]   ;;  %s1390_s4 = inlined_call_operand.vmem [shape: s32[16,1], index: 4, kind: input, shape index: {}]   ;;  %s1391_s5 = inlined_call_operand.vmem [shape: f32[16,1], index: 5, kind: input, shape index: {}]   ;;  %s1392_s6 = inlined_call_operand.vmem [shape: s32[1,128], index: 6, kind: input, shape index: {}]   ;;  %s1393_s7 = inlined_call_operand.vmem [shape: s32[1,128], index: 7, kind: input, shape index: {}]   ;;  %s1394_s8 = inlined_call_operand.vmem [shape: s32[1,128], index: 8, kind: input, shape index: {}]   ;;  %s1395_s9 = inlined_call_operand.vmem [shape: f32[1,128], index: 9, kind: input, shape index: {}]   ;;  %s1396_s10 = inlined_call_operand.hbm [shape: f32[16,128], index: 10, kind: output, shape index: {}]  }
   0x1   :  { %1397 = sst [smem:[#allocation11_spill]] %s1386_s0 }
   0x2   :  { %1398 = sst [smem:[#allocation12_spill]] %s1387_s1 }
   0x3   :  { %15 = vsyncpa [#allocation6], 0 }
   0x4   :  { %16 = vsyncpa [#allocation7], 0 }
   0x5   :  { %18 = vsyncpa [#allocation7 + $0x1], 0  ;;  %s1220_s13 = smov 0   ;;  %s1222_s14 = smov 0  }
   0x6   :  { %s1224_s15 = smov 0   ;;  %s1226_s16 = smov 0  }
   0x7   :  { %s1228_s17 = smov 0   ;;  %s1230_s18 = smov 0  }
   0x8 LB: > { %s888_s19 = sadd.s32 4294967295, %s1155_s18   ;;  %s889_s20 = sadd.s32 4294967294, %s1155_s18   ;;  %s1155_s18 = sphi %s1230_s18, %s24_s18   ;;  %s1151_s17 = sphi %s1228_s17, %s1411_s17   ;;  %s1147_s16 = sphi %s1226_s16, %s1410_s16   ;;  %s1143_s15 = sphi %s1224_s15, %s1409_s15   ;;  %s1139_s14 = sphi %s1222_s14, %s1408_s14   ;;  %s1135_s13 = sphi %s1220_s13, %s1407_s13  }
   0x9   : > { %s36_s21 = sadd.s32 1, %s1151_s17  ;;  %s303_s22 = sadd.s32 1, %s1143_s15 }
   0xa   : > { %p38_p0 = scmp.ge.s32.totalorder %s36_s21, 2  ;;  %p313_p1 = scmp.ne.s32.totalorder %s1143_s15, %s1139_s14 }
   0xb   : > { %p314_p2 = scmp.eq.s32.totalorder %s888_s19, 1  ;;  %p319_p3 = scmp.ne.s32.totalorder %s1139_s14, %s1135_s13 }
   0xc   : > { %s1413_s21 = smov (%p38_p0, %s36_s21), 0  ;;  %p320_p5 = scmp.eq.s32.totalorder %s889_s20, 1 }
   0xd   : > { %p1260_p4 = por %p314_p2, %p313_p1  ;;  %s300_s24 = ssub.s32 %s1151_s17, %s1413_s21 }
   0xe   : > { %p890_p6 = scmp.ge.s32.totalorder %s1155_s18, 1  ;;  %p301_p7 = scmp.eq.s32.totalorder %s300_s24, 0 }
   0xf   : > { %p1267_p8 = por %p320_p5, %p319_p3  ;;  %p327_p9 = scmp.lt.s32.totalorder %s1155_s18, 3 }
  0x10   : > { %s1273_s26 = scalar_select %p301_p7, %s1143_s15, %s303_s22  }
  0x11   : > { %p1275_p10 = pnand %p890_p6, %p327_p9  ;;  %p1279_p11 = scmp.eq.s32.totalorder %s888_s19, 0 }
  0x12   : > { %s1157_s29 = smov [#allocation5]  }
  0x13   : > { %p971_p12 = pneg %p1275_p10  ;;  %s341_s30 = sshll.u32 %s1157_s29, 4  ;;  %s342_s30 = int_to_ptr.vmem [resolvable:$true] %s341_s30 }
  0x14   : > { %s1060_s11 = scalar_lea.vmem %s342_s30, 2048  ;;  %p1068_p5 = scmp.lt.s32.totalorder %s342_s30, %s342_s30 }
  0x15   : > { %p972_p13 = pnand %p1279_p11, %p971_p12  ;;  %p1061_p1 = scmp.ne.s32.totalorder %s342_s30, %s1060_s11 }
  0x16   : > { %p1069_p6 = scmp.lt.s32.totalorder %s1060_s11, %s1060_s11 }
  0x17   : > { %p1051_p0 = pneg %p972_p13 }
  0x18   : > { %p1070_p7 = por %p1069_p6, %p1068_p5 }
  0x19   : > { %p1063_p2 = pnand %p1061_p1, %p1051_p0 }
  0x1b   : > { %p1064_p3 = pneg %p1063_p2 }
  0x1d   : > { %p1071_p9 = pnand %p1070_p7, %p1064_p3 }
  0x1f   : > { %1074 = shalt.err (!%p1071_p9)
}
  0x20   : > { %s1158_s12 = smov 128   ;;  %s1159_s19 = smov 8  }
  0x21   : > { %s1403_s1 = sld [smem:[#allocation12_spill]] }
  0x23   : > { %416 = sbr.rel (%p1275_p10) target bundleno = 759 (0x2f7), region = 60 }
  0x27   : > { %974 = dma.hbm_to_vmem [thread:$0]  (!%p972_p13), %s1403_s1, 2048, %s342_s30, [#allocation6], %s1158_s12, %s1158_s12, %s1159_s19  }
  0x28   : > { %1126 = dma.done.wait (%p1279_p11), [#allocation6], 2048  }
  0x29   : > { %1128 = vsyncadd (%p1279_p11), [#allocation6], 4294965248  ;;  %p481_p12 = scmp.lt.s32.totalorder %s1147_s16, 1  ;;  %v1160_v0 = vmov 0.0   ;;  %vm1161_vm0 = vmmov 0   ;;  %v1162_v1 = vmov 0  }
  0x2a   : > { %930 = vmatprep.subr.mxu0 %v1160_v0  ;;  %962 = vmatprep.mubr.msk.f32.mxu0 %vm1161_vm0, %v1160_v0  ;;  %v536_v2 = vld [vmem:[#allocation5 + $0x78] sm:$0xff]  ;;  %v535_v3 = vld [vmem:[#allocation5 + $0x70] sm:$0xff]  ;;  %v534_v5 = vld [vmem:[#allocation5 + $0x68] sm:$0xff]  ;;  %s1404_s0 = sld [smem:[#allocation11_spill]]  ;;  %v1163_v27 = vmov 142.85715  }
  0x2b   : > { %1038 = vset.pattern.permute.xlu1 %v1162_v1  ;;  %1037 = vset.pattern.permute.xlu0 %v1162_v1  ;;  %s482_s24 = scalar_select %p481_p12, %s1147_s16, 1  ;;  %v533_v8 = vld [vmem:[#allocation5 + $0x60] sm:$0xff]  ;;  %v532_v9 = vld [vmem:[#allocation5 + $0x58] sm:$0xff]  ;;  %v531_v10 = vld [vmem:[#allocation5 + $0x50] sm:$0xff] }
  0x2c   : > { %931 = vmatpush3.xpose.msra.mxu0 %v536_v2  ;;  %v530_v11 = vld [vmem:[#allocation5 + $0x48] sm:$0xff]  ;;  %v529_v12 = vld [vmem:[#allocation5 + $0x40] sm:$0xff]  ;;  %v528_v13 = vld [vmem:[#allocation5 + $0x38] sm:$0xff]  ;;  %s910_s20 = sshll.u32 %s1147_s16, 7 }
  0x2d   : > { %s1298_s27 = sshll.u32 %s482_s24, 3  ;;  %932 = vmatprep.subr.mxu0 %v1160_v0  ;;  %v527_v14 = vld [vmem:[#allocation5 + $0x30] sm:$0xff]  ;;  %v526_v15 = vld [vmem:[#allocation5 + $0x28] sm:$0xff]  ;;  %v525_v16 = vld [vmem:[#allocation5 + $0x20] sm:$0xff] }
  0x2e   : > { %s492_s30 = scalar_lea.vmem %s1389_s3, %s1298_s27  ;;  %s488_s19 = scalar_lea.vmem %s1388_s2, %s1298_s27  ;;  %v524_v17 = vld [vmem:[#allocation5 + $0x18] sm:$0xff]  ;;  %v523_v18 = vld [vmem:[#allocation5 + $0x10] sm:$0xff]  ;;  %v522_v19 = vld [vmem:[#allocation5 + $0x8] sm:$0xff] }
  0x2f   : > { %s496_s1 = scalar_lea.vmem %s1390_s4, %s1298_s27  ;;  %v611_v4 = vld [vmem:[%s492_s30] sm:$0xff]  ;;  %s500_s29 = scalar_lea.vmem %s1391_s5, %s1298_s27 }
  0x30   : > { %933 = vmatpush3.xpose.msra.mxu0 %v535_v3  ;;  %613 = vperm.xlu1 %1038, %v611_v4   ;;  %v607_v6 = vld [vmem:[%s488_s19] sm:$0xff]  ;;  %s484_s28 = scalar_lea.vmem %s1404_s0, %s1298_s27  ;;  %s478_s30 = sand.u32 1, %s1139_s14  }
  0x31   : > { %934 = vmatprep.subr.mxu0 %v1160_v0  ;;  %v615_v7 = vld [vmem:[%s496_s1] sm:$0xff]  ;;  %609 = vperm.xlu0 %1037, %v607_v6   ;;  %s899_s11 = sshll.u32 %s478_s30, 3  ;;  %s709_s1 = scalar_lea.hbm %s1396_s10, %s910_s20 }
  0x32   : > { %v521_v20 = vld [vmem:[#allocation5] sm:$0xff]  ;;  %s480_s12 = scalar_lea.vmem [#allocation8], %s899_s11  ;;  %s698_s24 = scalar_lea.sflag [#allocation7], %s478_s30 }
  0x33   : > { %v520_v21 = vld [vmem:[%s484_s28] sm:$0xff]  ;;  %s711_s19 = sshll.u32 %s480_s12, 4  ;;  %s1343_s19 = int_to_ptr.vmem [resolvable:$true] %s711_s19 }
  0x34   : > { %935 = vmatpush3.xpose.msra.mxu0 %v534_v5  ;;  %617 = vperm.xlu1 %1038, %v615_v7   ;;  %v907_v22 = vld [vmem:[%s1393_s7] ss:$0 sm:$0xff]  ;;  %s1075_s28 = scalar_lea.vmem %s1343_s19, 128 }
  0x35   : > { %936 = vmatprep.subr.mxu0 %v1160_v0  ;;  %v905_v23 = vld [vmem:[%s1392_s6] ss:$0 sm:$0xff]  ;;  %p1076_p10 = scmp.ne.s32.totalorder %s1343_s19, %s1075_s28 }
  0x36   : > { %v908_v30 = vld [vmem:[%s1395_s9] ss:$0 sm:$0xff] }
  0x37   : > { %v906_v33 = vld [vmem:[%s1394_s8] ss:$0 sm:$0xff]  ;;  %p1077_p11 = pnand %p1076_p10, %p1260_p4 }
  0x38   : > { %937 = vmatpush3.xpose.msra.mxu0 %v533_v8  ;;  %v687_v53 = vld [vmem:[%s500_s29] sm:$0xff]  ;;  %s1164_s29 = smov [#allocation8]  }
  0x39   : > { %938 = vmatprep.subr.mxu0 %v1160_v0  ;;  %p1078_p13 = pneg %p1077_p11  ;;  %s1079_s11 = sshll.u32 %s1164_s29, 4  ;;  %s1080_s11 = int_to_ptr.vmem [resolvable:$false] %s1079_s11 }
  0x3a   : > { %s1081_s16 = scalar_lea.vmem %s1080_s11, 256  ;;  %p1082_p0 = scmp.lt.s32.totalorder %s1343_s19, %s1080_s11 }
  0x3b   : > { %p1083_p1 = scmp.lt.s32.totalorder %s1081_s16, %s1075_s28 }
  0x3c   : > { %939 = vmatpush3.xpose.msra.mxu0 %v532_v9 }
  0x3d   : > { %940 = vmatprep.subr.mxu0 %v1160_v0  ;;  %p1084_p2 = por %p1083_p1, %p1082_p0 }
  0x3f   : > { %p1085_p3 = pnand %p1084_p2, %p1078_p13 }
  0x40   : > { %941 = vmatpush3.xpose.msra.mxu0 %v531_v10 }
  0x41   : > { %942 = vmatprep.subr.mxu0 %v1160_v0 }
  0x44   : > { %943 = vmatpush3.xpose.msra.mxu0 %v530_v11 }
  0x45   : > { %944 = vmatprep.subr.mxu0 %v1160_v0 }
  0x48   : > { %945 = vmatpush3.xpose.msra.mxu0 %v529_v12 }
  0x49   : > { %946 = vmatprep.subr.mxu0 %v1160_v0 }
  0x4c   : > { %947 = vmatpush3.xpose.msra.mxu0 %v528_v13 }
  0x4d   : > { %948 = vmatprep.subr.mxu0 %v1160_v0 }
  0x50   : > { %949 = vmatpush3.xpose.msra.mxu0 %v527_v14 }
  0x51   : > { %950 = vmatprep.subr.mxu0 %v1160_v0 }
  0x54   : > { %951 = vmatpush3.xpose.msra.mxu0 %v526_v15 }
  0x55   : > { %952 = vmatprep.subr.mxu0 %v1160_v0 }
  0x58   : > { %953 = vmatpush3.xpose.msra.mxu0 %v525_v16 }
  0x59   : > { %954 = vmatprep.subr.mxu0 %v1160_v0 }
  0x5c   : > { %955 = vmatpush3.xpose.msra.mxu0 %v524_v17 }
  0x5d   : > { %956 = vmatprep.subr.mxu0 %v1160_v0 }
  0x60   : > { %957 = vmatpush3.xpose.msra.mxu0 %v523_v18 }
  0x61   : > { %958 = vmatprep.subr.mxu0 %v1160_v0 }
  0x64   : > { %959 = vmatpush3.xpose.msra.mxu0 %v522_v19 }
  0x65   : > { %960 = vmatprep.subr.mxu0 %v1160_v0 }
  0x68   : > { %961 = vmatpush3.xpose.msra.mxu0 %v521_v20 }
  0x6b   : > { %963 = vmatmul.mubr.f32.vlgmr.msra.gmra.mxu0 %v520_v21 }
  0xab   : > { %v614_v24 = vpop.permute.xlu1 %613 }
  0xac   : > { %vm636_vm1 = vcmp.ne.s32.totalorder %v614_v24, %v907_v22  ;;  %v610_v25 = vpop.permute.xlu0 %609 }
  0xad   : > { %vm626_vm2 = vcmp.eq.s32.totalorder %v610_v25, %v905_v23 }
  0xae   : > { %vm1323_vm3 = vmand %vm626_vm2, %vm636_vm1  ;;  %v638_v28 = vsel %vm626_vm2, 14.285714, %v1163_v27 }
  0xaf   : > { %v618_v34 = vpop.permute.xlu1 %617 }
  0xb0   : > { %vm631_vm4 = vcmp.ne.s32.totalorder %v618_v34, %v906_v33 }
  0xb1   : > { %vm662_vm5 = vmand %vm626_vm2, %vm631_vm4 }
 0x12b   : > { %v603_v29 = vpop.f32.mrf.mxu0 }
 0x12c   : > { %v639_v31 = vmul.f32 %v638_v28, %v603_v29 }
 0x12d   : > { %v964_v32 = vpop.f32.mrf.mxu0 }
 0x12e   : > { %v647_v35 = vadd.f32 %v908_v30, %v639_v31 }
 0x130   : > { %v649_v36 = vmax.f32 %v647_v35, -1e+30  ;;  %v664_v39 = vsel %vm662_vm5, %v647_v35, 0.0 }
 0x132   : > { %v653_v37 = vsub.f32 %v647_v35, %v649_v36  ;;  %672 = vmax.xlane.f32.xlu0 %v649_v36  ;;  %v650_v43 = vsub.f32 -1e+30, %v649_v36 }
 0x134   : > { %v654_v38 = vmul.f32 1.442695, %v653_v37  ;;  %v651_v44 = vmul.f32 1.442695, %v650_v43 }
 0x136   : > { %1039 = vpow2.f32 %v654_v38  ;;  %682 = vadd.xlane.f32.xlu0 %v664_v39 }
 0x137   : > { %1041 = vpow2.f32 %v651_v44 }
 0x143   : > { %v1040_v40 = vpop.eup %1039 }
 0x144   : > { %v656_v41 = vsel %vm631_vm4, %v1040_v40, 0.0  ;;  %v1042_v48 = vpop.eup %1041 }
 0x145   : > { %v657_v42 = vsel %vm1323_vm3, 0.0, %v656_v41  ;;  %v659_v49 = vmul.f32 0.0, %v1042_v48 }
 0x147   : > { %v660_v50 = vadd.f32 %v659_v49, %v657_v42 }
 0x1bb   : > { %v673_v45 = vpop.xlane.xlu0 %672 }
 0x1bc   : > { %v675_v46 = vsub.f32 %v649_v36, %v673_v45 }
 0x1be   : > { %v676_v47 = vmul.f32 1.442695, %v675_v46 }
 0x1bf   : > { %v683_v57 = vpop.xlane.xlu0 %682 }
 0x1c0   : > { %1043 = vpow2.f32 %v676_v47 }
 0x1c1   : > { %1045 = vrcp.f32 %v687_v53 }
 0x1cd   : > { %v1044_v51 = vpop.eup %1043 }
 0x1ce   : > { %v678_v52 = vmul.f32 %v1044_v51, %v660_v50  ;;  %v1046_v55 = vpop.eup %1045 }
 0x1cf   : > { %v689_v59 = vmul.f32 %v1046_v55, %v683_v57 }
 0x1d0   : > { %679 = vadd.xlane.f32.xlu1 %v678_v52 }
 0x259   : > { %v680_v54 = vpop.xlane.xlu1 %679 }
 0x25a   : > { %1047 = vlog2.f32 %v680_v54 }
 0x267   : > { %v1048_v56 = vpop.eup %1047 }
 0x268   : > { %v685_v58 = vmul.f32 0.6931472, %v1048_v56 }
 0x26a   : > { %v686_v60 = vadd.f32 %v685_v58, %v673_v45 }
 0x26c   : > { %v690_v61 = vsub.f32 %v686_v60, %v689_v59 }
 0x26e   : > { %693 = vperm.xlu0 %1037, %v690_v61  }
 0x2e9   : > { %v694_v62 = vpop.permute.xlu0 %693 }
 0x2ea   : > { %696 = vst [vmem:[%s480_s12] sm:$0xff] %v694_v62 }
 0x2eb   : > { %1088 = shalt.err (!%p1085_p3)
}
 0x2ec   : > { %s1089_s27 = scalar_lea.hbm %s709_s1, 128  ;;  %s1093_s20 = scalar_lea.hbm %s1396_s10, 256 }
 0x2ed   : > { %p1090_p5 = scmp.ne.s32.totalorder %s709_s1, %s1089_s27  ;;  %p1094_p9 = scmp.lt.s32.totalorder %s709_s1, %s1396_s10 }
 0x2ee   : > { %p1095_p12 = scmp.lt.s32.totalorder %s1093_s20, %s1089_s27 }
 0x2ef   : > { %p1091_p6 = pnand %p1090_p5, %p1260_p4 }
 0x2f0   : > { %p1096_p10 = por %p1095_p12, %p1094_p9 }
 0x2f1   : > { %p1092_p7 = pneg %p1091_p6 }
 0x2f3   : > { %p1097_p11 = pnand %p1096_p10, %p1092_p7 }
 0x2f5   : > { %1100 = shalt.err (!%p1097_p11)
}
 0x2f6   : > { %969 = dma.vmem_to_hbm [thread:$0]  (%p1260_p4), %s1343_s19, 128, %s709_s1, %s698_s24  }
 0x2f7 PF: > { %p981_p13 = scmp.ge.s32.totalorder %s1155_s18, 2  ;;  %s723_s28 = sand.u32 1, %s1135_s13  }
 0x2f8   : > { %s724_s29 = scalar_lea.sflag [#allocation7], %s723_s28 }
 0x2f9   : > { %p976_p0 = pnand %p981_p13, %p1267_p8 }
 0x2fb   : > { %p977_p1 = pneg %p976_p0 }
 0x2fd   : > { %1130 = dma.done.wait (%p977_p1), %s724_s29, 128  }
 0x2fe   : > { %1132 = vsyncadd (%p977_p1), %s724_s29, 4294967168  ;;  %s24_s18 = sadd.s32 1, %s1155_s18   ;;  %s1407_s13 = smov %s1139_s14 }
 0x2ff   : > { %p21_p2 = scmp.ge.s32.totalorder %s24_s18, 4   ;;  %s1408_s14 = smov %s1143_s15 }
 0x300   : > { %s1409_s15 = smov %s1273_s26  ;;  %s1410_s16 = smov %s1151_s17 }
 0x301   : > { %s1411_s17 = smov %s1413_s21  ;;  %23 = sbr.rel (!%p21_p2) target bundleno = 8 (0x8), region = 133 }
 0x306   :  { %729 = vsyncpa [#allocation6], 1 }
 0x307   :  { %731 = vsyncpa [#allocation6 + $0x1], 1 }
 0x308   :  { %732 = vsyncpa [#allocation7], 1 }
 0x309   :  { %734 = vsyncpa [#allocation7 + $0x1], 1 }

</bundles_post_ra>
